<compile_context>
chip_gen: v5e
topology: v5e:2x2
jax: 0.10.0
libtpu: 0.0.40
codegen_flags: <defaults>
</compile_context>

<pallas_src>
import jax
import jax.numpy as jnp
from jax.experimental import pallas as pl
from jax.experimental.pallas import tpu as pltpu


# ----------------------------------------------------------------------------
# Kernels
# ----------------------------------------------------------------------------

def _fused_kernel(x_ref, o_ref):
    """Whole (N, D) array resident in VMEM: abs-max over rows + scale."""
    x = x_ref[...]
    m = jnp.max(jnp.abs(x), axis=0, keepdims=True)        # (1, D)
    o_ref[...] = x * (1.0 / m)                             # cheap (1,D) recip


def _make_max_abs_kernel(n_rows, tm, mask_tail):
    """Column-wise max(|x|), accumulated over the row-tile grid axis (last)."""
    def kernel(x_ref, m_ref):
        @pl.when(pl.program_id(1) == 0)
        def _init():
            m_ref[...] = jnp.zeros_like(m_ref)             # |x| >= 0 identity

        ax = jnp.abs(x_ref[...])
        if mask_tail:
            rows = pl.program_id(1) * tm + jax.lax.broadcasted_iota(
                jnp.int32, ax.shape, 0)
            ax = jnp.where(rows < n_rows, ax, jnp.zeros_like(ax))
        m_ref[...] = jnp.maximum(m_ref[...],
                                 jnp.max(ax, axis=0, keepdims=True))
    return kernel


def _scale_kernel(x_ref, m_ref, o_ref):
    """o = x * (1/m): reciprocal on the (1, td) vector only, bulk work on VPU."""
    inv = 1.0 / m_ref[...]                                 # (1, td)
    o_ref[...] = x_ref[...] * inv


# ----------------------------------------------------------------------------
# Tiling heuristics
# ----------------------------------------------------------------------------

_TARGET_BLOCK_BYTES = 2 << 20      # ~2 MiB per block: fits v5e/v6e/v7x budgets
_FUSED_LIMIT_BYTES = 4 << 20       # whole-array fused path threshold


def _choose_tiles(N, D, itemsize, row_tile, d_tile):
    # Lane (feature) tile: multiple of 128, or the full dim if not aligned.
    if d_tile is not None:
        td = d_tile if (d_tile % 128 == 0 and d_tile <= D) else D
    elif D % 128 == 0:
        td = min(D, 1024)
    else:
        td = D

    # Row tile: multiple of the sublane packing, or the full dim when small.
    mult = max(8, 32 // itemsize)      # 8 for f32, 16 for bf16, 32 for int8
    if row_tile is not None:
        tm = row_tile
    else:
        tm = _TARGET_BLOCK_BYTES // (td * itemsize)
    tm = max(mult, (tm // mult) * mult)
    tm = min(tm, 1024)
    if tm >= N:
        tm = N                          # single row tile (full dim is legal)
    return tm, td


# ----------------------------------------------------------------------------
# Wrapper
# ----------------------------------------------------------------------------

def embed_norm(x, *, row_tile=None, d_tile=None,
               fused_limit_bytes=_FUSED_LIMIT_BYTES):
    """Pallas implementation of EmbedNorm.forward for any input shape (..., D)."""
    shape = x.shape
    D = shape[-1]
    x2 = x.reshape(-1, D)               # row-major flatten == torch .view(1,-1,D)
    N = x2.shape[0]
    itemsize = jnp.dtype(x2.dtype).itemsize
    total_bytes = N * D * itemsize

    # ---- Fused single-pass path for small inputs (the common case). ----
    if total_bytes <= fused_limit_bytes:
        y2 = pl.pallas_call(
            _fused_kernel,
            out_shape=jax.ShapeDtypeStruct((N, D), x2.dtype),
            compiler_params=pltpu.CompilerParams(vmem_limit_bytes=40 << 20),
        )(x2)
        return y2.reshape(shape)

    # ---- Two-pass tiled path for large inputs. ----
    tm, td = _choose_tiles(N, D, itemsize, row_tile, d_tile)
    n_row_tiles = pl.cdiv(N, tm)
    n_d_tiles = pl.cdiv(D, td)
    mask_tail = (N % tm) != 0

    blk_bytes = tm * td * itemsize
    vec_bytes = td * itemsize
    need = 4 * blk_bytes + 4 * vec_bytes
    vmem_limit = min(max(2 * need, 32 << 20), 48 << 20)

    # Pass 1: column-wise max(|x|); reduction (row) axis is the LAST grid axis
    # so the (1, td) accumulator block stays VMEM-resident across it.
    max_abs = pl.pallas_call(
        _make_max_abs_kernel(N, tm, mask_tail),
        out_shape=jax.ShapeDtypeStruct((1, D), x2.dtype),
        grid_spec=pltpu.PrefetchScalarGridSpec(
            num_scalar_prefetch=0,
            grid=(n_d_tiles, n_row_tiles),
            in_specs=[pl.BlockSpec((tm, td), lambda j, i: (i, j))],
            out_specs=pl.BlockSpec((1, td), lambda j, i: (0, j)),
        ),
        compiler_params=pltpu.CompilerParams(
            dimension_semantics=("parallel", "arbitrary"),
            vmem_limit_bytes=vmem_limit),
    )(x2)

    # Pass 2: broadcasted scale (reciprocal-multiply). Fully parallel grid;
    # out-of-bounds tail rows/lanes are dropped at writeback by Pallas.
    y2 = pl.pallas_call(
        _scale_kernel,
        out_shape=jax.ShapeDtypeStruct((N, D), x2.dtype),
        grid_spec=pltpu.PrefetchScalarGridSpec(
            num_scalar_prefetch=0,
            grid=(n_d_tiles, n_row_tiles),
            in_specs=[pl.BlockSpec((tm, td), lambda j, i: (i, j)),
                      pl.BlockSpec((1, td), lambda j, i: (0, j))],
            out_specs=pl.BlockSpec((tm, td), lambda j, i: (i, j)),
        ),
        compiler_params=pltpu.CompilerParams(
            dimension_semantics=("parallel", "parallel"),
            vmem_limit_bytes=vmem_limit),
    )(x2, max_abs)

    return y2.reshape(shape)


# ----------------------------------------------------------------------------
# Test
# ----------------------------------------------------------------------------

def _reference(x):
    D = x.shape[-1]
    x2 = x.reshape(1, -1, D)
    m = jnp.max(jnp.abs(x2), axis=1)                       # (1, D)
    return (x2 / m[:, None, :]).reshape(x.shape)


if __name__ == "__main__":
    # Small embedding-like shape: (batch=2, seq=8, hidden=128) -> fused path.
    key = jax.random.PRNGKey(0)
    x = jax.random.normal(key, (2, 8, 128), dtype=jnp.float32)
    y = jax.block_until_ready(embed_norm(x))
    assert y.shape == x.shape and y.dtype == x.dtype
    assert jnp.allclose(y, _reference(x), atol=1e-6, rtol=1e-5)

    # Exercise the tiled two-pass path (2-D grid, masked tail tile) on a small
    # input by forcing small tiles and disabling the fused path.
    xb = jax.random.normal(jax.random.PRNGKey(1), (2, 100, 256),
                           dtype=jnp.float32)
    yb = jax.block_until_ready(
        embed_norm(xb, row_tile=64, d_tile=128, fused_limit_bytes=0))
    assert yb.shape == xb.shape and yb.dtype == xb.dtype
    assert jnp.allclose(yb, _reference(xb), atol=1e-6, rtol=1e-5)

    print("KERNEL_OK")
</pallas_src>

<mosaic_0001>
module attributes {stable_mosaic.version = 11 : i64} {
  func.func @_fused_kernel(%arg0: memref<16x128xf32, #tpu.memory_space<vmem>>, %arg1: memref<16x128xf32, #tpu.memory_space<vmem>>) attributes {dimension_semantics = [], scalar_prefetch = 0 : i64, scratch_operands = 0 : i64, tpu.core_type = #tpu.core_type<tc>} {
    %c0 = arith.constant 0 : index
    %c0_0 = arith.constant 0 : index
    %0 = vector.load %arg0[%c0, %c0_0] : memref<16x128xf32, #tpu.memory_space<vmem>>, vector<16x128xf32>
    %1 = math.absf %0 : vector<16x128xf32>
    %cst = arith.constant dense<0xFF800000> : vector<128xf32>
    %2 = vector.multi_reduction <maximumf>, %1, %cst [0] : vector<16x128xf32> to vector<128xf32>
    %3 = vector.shape_cast %2 : vector<128xf32> to vector<1x128xf32>
    %cst_1 = arith.constant 1.000000e+00 : f32
    %4 = vector.broadcast %cst_1 : f32 to vector<1x128xf32>
    %5 = arith.divf %4, %3 : vector<1x128xf32>
    %6 = vector.broadcast %5 : vector<1x128xf32> to vector<16x128xf32>
    %7 = arith.mulf %0, %6 : vector<16x128xf32>
    %c0_2 = arith.constant 0 : index
    %c0_3 = arith.constant 0 : index
    %8 = vector.load %arg1[%c0_2, %c0_3] : memref<16x128xf32, #tpu.memory_space<vmem>>, vector<16x128xf32>
    tpu.vector_store %arg1[%c0_2, %c0_3], %7 {strides = array<i32>} : memref<16x128xf32, #tpu.memory_space<vmem>>, vector<16x128xf32>,
    return
  }
}

</mosaic_0001>

<bundles_post_ra>
// kernel: tpu_custom_call.1
= control target key start
LH: loop header
LB: loop body
LE: loop exit
PB: predicated region body
PF: predicated region fallthrough
CT: control target
= control target key end

     0   :  { %6 = vsyncpa [#allocation3], 0  ;;  %s158_s0 = inlined_call_operand.hbm [shape: f32[16,128], index: 0, kind: input, shape index: {}]   ;;  %s159_s1 = inlined_call_operand.hbm [shape: f32[16,128], index: 1, kind: output, shape index: {}]  }
   0x1   :  { %7 = vsyncpa [#allocation4], 0  ;;  %s12_s8 = sshll.u32 %s158_s0, 4  ;;  %s132_s9 = smov [#allocation2]   ;;  %s13_s8 = int_to_ptr.hbm [resolvable:$true] %s12_s8 }
   0x2   :  { %s14_s10 = sshll.u32 %s132_s9, 4  ;;  %s133_s11 = smov 128   ;;  %s15_s10 = int_to_ptr.vmem [resolvable:$true] %s14_s10 }
   0x3   :  { %s134_s12 = smov 8  }
   0x4   :  { %20 = dma.hbm_to_vmem [thread:$0]  %s13_s8, 256, %s15_s10, [#allocation3], %s133_s11, %s133_s11, %s134_s12  }
   0x5   :  { %128 = dma.done.wait [#allocation3], 256  }
   0x6   :  { %129 = vsyncadd [#allocation3], 4294967040  ;;  %v25_v0 = vld [vmem:[#allocation2] sm:$0xff]  ;;  %v26_v1 = vld [vmem:[#allocation2 + $0x8] sm:$0xff]  ;;  %s135_s0 = smov [#allocation5]   ;;  %s61_s16 = sshll.u32 %s159_s1, 4  ;;  %s62_s16 = int_to_ptr.hbm [resolvable:$true] %s61_s16 }
   0x7   :  { %v27_v2 = vand.u32 2147483647, %v25_v0  ;;  %v28_v3 = vand.u32 2147483647, %v26_v1  ;;  %s59_s13 = sshll.u32 %s135_s0, 4  ;;  %s60_s13 = int_to_ptr.vmem [resolvable:$true] %s59_s13 }
   0x9   :  { %v29_v4 = vmax.f32 %v27_v2, %v28_v3 }
   0xb   :  { %v30_v5 = vrot.slane %v29_v4, 4 }
   0xd   :  { %v31_v6 = vmax.f32 %v29_v4, %v30_v5 }
   0xf   :  { %v32_v7 = vrot.slane %v31_v6, 2 }
  0x11   :  { %v33_v8 = vmax.f32 %v31_v6, %v32_v7 }
  0x13   :  { %v34_v9 = vrot.slane %v33_v8, 1 }
  0x15   :  { %v35_v10 = vmax.f32 %v33_v8, %v34_v9 }
  0x17   :  { %78 = vrcp.f32 %v35_v10  ;;  %v47_v13 = vand.u32 2147483648, %v35_v10  ;;  %vm41_vm0 = vweird.f32 %v35_v10  ;;  %v45_v15 = vand.u32 2147483647, %v35_v10 }
  0x19   :  { %v48_v17 = vor.u32 1.1754944e-38, %v47_v13  ;;  %vm46_vm3 = vcmp.eq.f32.partialorder %v45_v15, 8.507059e+37 }
  0x1d   :  { %v79_v11 = vpop.eup %78 }
  0x1e   :  { %v37_v12 = vmul.f32 %v79_v11, %v35_v10  ;;  %vm42_vm1 = vweird.f32 %v79_v11 }
  0x1f   :  { %vm43_vm2 = vmor %vm41_vm0, %vm42_vm1 }
  0x20   :  { %v38_v14 = vsub.f32 1.0, %v37_v12 }
  0x22   :  { %v39_v16 = vmul.f32 %v79_v11, %v38_v14 }
  0x24   :  { %v40_v18 = vadd.f32 %v79_v11, %v39_v16 }
  0x26   :  { %v44_v19 = vsel %vm43_vm2, %v79_v11, %v40_v18 }
  0x27   :  { %v49_v20 = vsel %vm46_vm3, %v48_v17, %v44_v19 }
  0x28   :  { %v51_v21 = vmul.f32 %v49_v20, %v25_v0  ;;  %v52_v22 = vmul.f32 %v49_v20, %v26_v1 }
  0x2a   :  { %53 = vst [vmem:[#allocation5] sm:$0xff] %v51_v21 }
  0x2b   :  { %54 = vst [vmem:[#allocation5 + $0x8] sm:$0xff] %v52_v22 }
  0x2c   :  { %67 = dma.vmem_to_hbm [thread:$0]  %s60_s13, 256, %s62_s16, [#allocation4], %s133_s11, %s133_s11, %s134_s12  }
  0x2d   :  { %130 = dma.done.wait [#allocation4], 256  }
  0x2e   :  { %131 = vsyncadd [#allocation4], 4294967040 }
  0x2f   :  { %72 = vsyncpa [#allocation3], 1 }
  0x30   :  { %73 = vsyncpa [#allocation4], 1 }

</bundles_post_ra>
